<compile_context>
chip_gen: v7x
topology: tpu7x:2x2x1
jax: 0.10.0
libtpu: 0.0.40
codegen_flags: <defaults>
</compile_context>

<pallas_src>
import functools

import jax
import jax.numpy as jnp
from jax.experimental import pallas as pl
from jax.experimental.pallas import tpu as pltpu


def pack_params(w_conv, b_conv, w_fc, b_fc, *, height, width):
    """Fold backbone weights into MXU/lane-friendly operands (setup time).

    Returns:
      wrow:     (KH, (W+KW-1)*Cin, W*Cmid) row-Toeplitz conv matrices; one per
                vertical tap, horizontal taps + Cin->Cmid mixing folded into a
                single lane-dense matmul.
      bc_tiled: (1, W*Cmid)  conv bias tiled over the interleaved (w, cmid) lanes.
      wf_pad:   (W*Cmid, EP) FC weight with width-pooling and 1/(H*W) GAP scale
                folded in; columns zero-padded to a 128-lane multiple.
      bf_pad:   (1, EP)      FC bias, zero-padded.
      e_dim:    true embedding width E (static int).
    """
    KH, KW, Cin, Cmid = w_conv.shape
    E = w_fc.shape[1]
    N = width * Cmid
    EP = ((E + 127) // 128) * 128

    # wrow[dy, wp*Cin+ci, wo*Cmid+co] = w_conv[dy, wp-wo, ci, co] if 0<=wp-wo<KW
    wp = jnp.arange(width + KW - 1)
    wo = jnp.arange(width)
    dx = wp[:, None] - wo[None, :]                               # (Wp, W)
    valid = ((dx >= 0) & (dx < KW)).astype(w_conv.dtype)
    g = w_conv[:, jnp.clip(dx, 0, KW - 1)]                       # (KH, Wp, W, Cin, Cmid)
    g = g * valid[None, :, :, None, None]
    wrow = jnp.transpose(g, (0, 1, 3, 2, 4)).reshape(
        KH, (width + KW - 1) * Cin, N)

    bc_tiled = jnp.tile(b_conv.reshape(1, Cmid), (1, width))     # (1, N)

    wf_big = jnp.tile(w_fc / float(height * width), (width, 1))  # (N, E)
    wf_pad = jnp.pad(wf_big, ((0, 0), (0, EP - E)))
    bf_pad = jnp.pad(b_fc.reshape(1, E), ((0, 0), (0, EP - E)))
    return wrow, bc_tiled, wf_pad, bf_pad, E


def _proto_kernel(xp_ref, wr_ref, bc_ref, wf_ref, bf_ref, out_ref):
    # xp_ref: (Bt, H+KH-1, (W+KW-1)*Cin)  zero-padded input, (w, cin) merged in lanes
    # wr_ref: (KH, (W+KW-1)*Cin, W*Cmid)  row-Toeplitz conv weights
    # bc_ref: (1, W*Cmid); wf_ref: (W*Cmid, EP); bf_ref: (1, EP); out_ref: (Bt, EP)
    Bt, Hp, _ = xp_ref.shape
    KH, KD, N = wr_ref.shape
    H = Hp - (KH - 1)

    # Conv as KH row-shifted, lane-dense Toeplitz matmuls, f32-accumulated on the MXU.
    conv = jnp.zeros((Bt, H, N), dtype=jnp.float32)
    for dy in range(KH):                                     # static unroll (3 taps)
        rows = xp_ref[:, dy:dy + H, :]                       # (Bt, H, KD)
        w_b = jnp.broadcast_to(wr_ref[dy], (Bt, KD, N))      # (Bt, KD, N)
        conv = conv + jnp.einsum('bhk,bkn->bhn', rows, w_b,
                                 preferred_element_type=jnp.float32)

    bc = bc_ref[...].reshape(1, 1, N)
    conv = jnp.maximum(conv + bc, 0.0)                       # bias + ReLU  (Bt, H, N)

    # Global average pool: only the row-sum is done here; the width-sum and the
    # 1/(H*W) scale are folded into wf_ref, so the FC matmul finishes the pooling.
    pooled = jnp.sum(conv, axis=1)                           # (Bt, N)
    emb = jnp.dot(pooled, wf_ref[...],
                  preferred_element_type=jnp.float32) + bf_ref[...]   # (Bt, EP)

    # L2 normalize along the embedding dim via EUP rsqrt (padded lanes are zero,
    # so they do not contribute).  Matches PyTorch x / x.norm(dim=1): no epsilon.
    ssq = jnp.sum(emb * emb, axis=-1, keepdims=True)
    out_ref[...] = emb * jax.lax.rsqrt(ssq)


@functools.partial(jax.jit, static_argnames=("e_dim", "batch_tile"))
def prototypical_forward(x_nchw, wrow, bc_tiled, wf_pad, bf_pad, *,
                         e_dim, batch_tile=8):
    """x_nchw: (B, Cin, H, W) float32 -> (B, E) L2-normalized embeddings."""
    B, Cin, H, W = x_nchw.shape
    KH = wrow.shape[0]
    pad = KH // 2
    EP = wf_pad.shape[1]

    # Layout glue only (no im2col): NCHW -> NHWC, 'same' zero pad, merge (w, cin)
    # into the lane axis so the kernel sees (B, H+2p, (W+2p)*Cin).
    x_nhwc = jnp.transpose(x_nchw, (0, 2, 3, 1))
    xp = jnp.pad(x_nhwc, ((0, 0), (pad, pad), (pad, pad), (0, 0)))
    Hp, WC = H + 2 * pad, (W + 2 * pad) * Cin
    xp2 = xp.reshape(B, Hp, WC)

    # Pad batch to a multiple of the per-step tile -> sublane-dense blocks and a
    # dense (Bt, 128) output store.
    Bt = batch_tile
    Bp = pl.cdiv(B, Bt) * Bt
    if Bp != B:
        xp2 = jnp.pad(xp2, ((0, Bp - B), (0, 0), (0, 0)))

    out = pl.pallas_call(
        _proto_kernel,
        out_shape=jax.ShapeDtypeStruct((Bp, EP), jnp.float32),
        grid_spec=pltpu.PrefetchScalarGridSpec(
            num_scalar_prefetch=0,
            grid=(Bp // Bt,),
            in_specs=[
                pl.BlockSpec((Bt, Hp, WC), lambda b: (b, 0, 0)),
                pl.BlockSpec(wrow.shape, lambda b: (0, 0, 0)),
                pl.BlockSpec(bc_tiled.shape, lambda b: (0, 0)),
                pl.BlockSpec(wf_pad.shape, lambda b: (0, 0)),
                pl.BlockSpec(bf_pad.shape, lambda b: (0, 0)),
            ],
            out_specs=pl.BlockSpec((Bt, EP), lambda b: (b, 0)),
        ),
        compiler_params=pltpu.CompilerParams(
            dimension_semantics=("parallel",)),
    )(xp2, wrow, bc_tiled, wf_pad, bf_pad)
    return out[:B, :e_dim]


def _reference_forward(x_nchw, w_conv, b_conv, w_fc, b_fc):
    """Pure-JAX reference of the same synthetic backbone (highest precision)."""
    B, Cin, H, W = x_nchw.shape
    KH, KW = w_conv.shape[:2]
    hi = jax.lax.Precision.HIGHEST
    x = jnp.transpose(x_nchw, (0, 2, 3, 1))
    xp = jnp.pad(x, ((0, 0), (KH // 2, KH // 2), (KW // 2, KW // 2), (0, 0)))
    conv = jnp.zeros((B, H, W, w_conv.shape[3]), jnp.float32)
    for dy in range(KH):
        for dx in range(KW):
            conv = conv + jnp.einsum('bhwc,co->bhwo',
                                     xp[:, dy:dy + H, dx:dx + W, :],
                                     w_conv[dy, dx], precision=hi)
    conv = jnp.maximum(conv + b_conv, 0.0)
    pooled = jnp.mean(conv, axis=(1, 2))
    emb = jnp.dot(pooled, w_fc, precision=hi) + b_fc
    return emb / jnp.linalg.norm(emb, axis=1, keepdims=True)


if __name__ == "__main__":
    # Small deterministic shapes consistent with the module's forward:
    # x: (batch=2, channels=4, H=16, W=16)
    B, Cin, H, W = 2, 4, 16, 16
    Cmid, E, k = 8, 32, 3

    key = jax.random.PRNGKey(0)
    kx, kw1, kb1, kw2, kb2 = jax.random.split(key, 5)

    x = jax.random.normal(kx, (B, Cin, H, W), dtype=jnp.float32)

    # deterministic synthetic parameters (conv weight stored as (kh, kw, Cin, Cmid))
    w_conv = 0.1 * jax.random.normal(kw1, (k, k, Cin, Cmid), dtype=jnp.float32)
    b_conv = 0.01 * jax.random.normal(kb1, (Cmid,), dtype=jnp.float32)
    w_fc = 0.1 * jax.random.normal(kw2, (Cmid, E), dtype=jnp.float32)
    b_fc = 0.01 * jax.random.normal(kb2, (E,), dtype=jnp.float32)

    wrow, bc_t, wf_p, bf_p, e_dim = pack_params(
        w_conv, b_conv, w_fc, b_fc, height=H, width=W)

    emb = prototypical_forward(x, wrow, bc_t, wf_p, bf_p,
                               e_dim=e_dim, batch_tile=8)
    emb = jax.block_until_ready(emb)

    # sanity: shape, unit norms along dim=1, and agreement with the pure-JAX reference
    ref = _reference_forward(x, w_conv, b_conv, w_fc, b_fc)
    norms = jnp.linalg.norm(emb, axis=1)
    assert emb.shape == (B, E)
    assert bool(jnp.all(jnp.abs(norms - 1.0) < 1e-3))
    assert bool(jnp.max(jnp.abs(emb - ref)) < 1e-2)

    print("KERNEL_OK")
</pallas_src>

<mosaic_0001>
module attributes {stable_mosaic.version = 11 : i64} {
  func.func @_proto_kernel(%arg0: i32, %arg1: memref<8x18x72xf32, #tpu.memory_space<vmem>>, %arg2: memref<3x72x128xf32, #tpu.memory_space<vmem>>, %arg3: memref<1x128xf32, #tpu.memory_space<vmem>>, %arg4: memref<128x128xf32, #tpu.memory_space<vmem>>, %arg5: memref<1x128xf32, #tpu.memory_space<vmem>>, %arg6: memref<8x128xf32, #tpu.memory_space<vmem>>) attributes {dimension_semantics = [#tpu.dimension_semantics<parallel>], iteration_bounds = array<i64: 1>, scalar_prefetch = 0 : i64, scratch_operands = 0 : i64, tpu.core_type = #tpu.core_type<tc>, window_params = [{transform_indices = @transform_0, window_bounds = array<i64: 8, 18, 72>}, {pipeline_mode = #tpu.pipeline_mode<synchronous>, transform_indices = @transform_1, window_bounds = array<i64: 3, 72, 128>}, {pipeline_mode = #tpu.pipeline_mode<synchronous>, transform_indices = @transform_2, window_bounds = array<i64: 1, 128>}, {pipeline_mode = #tpu.pipeline_mode<synchronous>, transform_indices = @transform_3, window_bounds = array<i64: 128, 128>}, {pipeline_mode = #tpu.pipeline_mode<synchronous>, transform_indices = @transform_4, window_bounds = array<i64: 1, 128>}, {transform_indices = @transform_5, window_bounds = array<i64: 8, 128>}]} {
    %cst = arith.constant 0.000000e+00 : f32
    %0 = vector.broadcast %cst : f32 to vector<8x16x128xf32>
    %c0 = arith.constant 0 : index
    %c0_0 = arith.constant 0 : index
    %c0_1 = arith.constant 0 : index
    %1 = vector.load %arg1[%c0, %c0_0, %c0_1] : memref<8x18x72xf32, #tpu.memory_space<vmem>>, vector<8x16x72xf32>
    %c0_2 = arith.constant 0 : index
    %c0_3 = arith.constant 0 : index
    %c0_4 = arith.constant 0 : index
    %2 = vector.load %arg2[%c0_2, %c0_3, %c0_4] : memref<3x72x128xf32, #tpu.memory_space<vmem>>, vector<1x72x128xf32>
    %3 = vector.shape_cast %2 : vector<1x72x128xf32> to vector<72x128xf32>
    %4 = vector.shape_cast %3 : vector<72x128xf32> to vector<1x72x128xf32>
    %5 = vector.broadcast %4 : vector<1x72x128xf32> to vector<8x72x128xf32>
    "tpu.trace_start"() <{level = 10 : i32, message = "bhk,bkn->bhn"}> : () -> ()
    %cst_5 = arith.constant dense<0.000000e+00> : vector<8x16x128xf32>
    %6 = tpu.matmul %1, %5, %cst_5 {dimension_numbers = #tpu.dot_dimension_numbers<[2], [1], [1], [2], [0, 0, 0, 1, 1, 2], [0], [0]>} : vector<8x16x72xf32>, vector<8x72x128xf32>, vector<8x16x128xf32> -> vector<8x16x128xf32>
    "tpu.trace_stop"() : () -> ()
    %7 = arith.addf %0, %6 : vector<8x16x128xf32>
    %c0_6 = arith.constant 0 : index
    %c1 = arith.constant 1 : index
    %c0_7 = arith.constant 0 : index
    %8 = vector.load %arg1[%c0_6, %c1, %c0_7] : memref<8x18x72xf32, #tpu.memory_space<vmem>>, vector<8x16x72xf32>
    %c1_8 = arith.constant 1 : index
    %c0_9 = arith.constant 0 : index
    %c0_10 = arith.constant 0 : index
    %9 = vector.load %arg2[%c1_8, %c0_9, %c0_10] : memref<3x72x128xf32, #tpu.memory_space<vmem>>, vector<1x72x128xf32>
    %10 = vector.shape_cast %9 : vector<1x72x128xf32> to vector<72x128xf32>
    %11 = vector.shape_cast %10 : vector<72x128xf32> to vector<1x72x128xf32>
    %12 = vector.broadcast %11 : vector<1x72x128xf32> to vector<8x72x128xf32>
    "tpu.trace_start"() <{level = 10 : i32, message = "bhk,bkn->bhn"}> : () -> ()
    %cst_11 = arith.constant dense<0.000000e+00> : vector<8x16x128xf32>
    %13 = tpu.matmul %8, %12, %cst_11 {dimension_numbers = #tpu.dot_dimension_numbers<[2], [1], [1], [2], [0, 0, 0, 1, 1, 2], [0], [0]>} : vector<8x16x72xf32>, vector<8x72x128xf32>, vector<8x16x128xf32> -> vector<8x16x128xf32>
    "tpu.trace_stop"() : () -> ()
    %14 = arith.addf %7, %13 : vector<8x16x128xf32>
    %c0_12 = arith.constant 0 : index
    %c2 = arith.constant 2 : index
    %c0_13 = arith.constant 0 : index
    %15 = vector.load %arg1[%c0_12, %c2, %c0_13] : memref<8x18x72xf32, #tpu.memory_space<vmem>>, vector<8x16x72xf32>
    %c2_14 = arith.constant 2 : index
    %c0_15 = arith.constant 0 : index
    %c0_16 = arith.constant 0 : index
    %16 = vector.load %arg2[%c2_14, %c0_15, %c0_16] : memref<3x72x128xf32, #tpu.memory_space<vmem>>, vector<1x72x128xf32>
    %17 = vector.shape_cast %16 : vector<1x72x128xf32> to vector<72x128xf32>
    %18 = vector.shape_cast %17 : vector<72x128xf32> to vector<1x72x128xf32>
    %19 = vector.broadcast %18 : vector<1x72x128xf32> to vector<8x72x128xf32>
    "tpu.trace_start"() <{level = 10 : i32, message = "bhk,bkn->bhn"}> : () -> ()
    %cst_17 = arith.constant dense<0.000000e+00> : vector<8x16x128xf32>
    %20 = tpu.matmul %15, %19, %cst_17 {dimension_numbers = #tpu.dot_dimension_numbers<[2], [1], [1], [2], [0, 0, 0, 1, 1, 2], [0], [0]>} : vector<8x16x72xf32>, vector<8x72x128xf32>, vector<8x16x128xf32> -> vector<8x16x128xf32>
    "tpu.trace_stop"() : () -> ()
    %21 = arith.addf %14, %20 : vector<8x16x128xf32>
    %c0_18 = arith.constant 0 : index
    %c0_19 = arith.constant 0 : index
    %22 = vector.load %arg3[%c0_18, %c0_19] : memref<1x128xf32, #tpu.memory_space<vmem>>, vector<1x128xf32>
    %23 = vector.shape_cast %22 : vector<1x128xf32> to vector<1x1x128xf32>
    %24 = vector.broadcast %23 : vector<1x1x128xf32> to vector<8x16x128xf32>
    %25 = arith.addf %21, %24 : vector<8x16x128xf32>
    %cst_20 = arith.constant 0.000000e+00 : f32
    %26 = vector.broadcast %cst_20 : f32 to vector<8x16x128xf32>
    %27 = arith.maximumf %25, %26 : vector<8x16x128xf32>
    %cst_21 = arith.constant dense<0.000000e+00> : vector<8x128xf32>
    %28 = vector.multi_reduction <add>, %27, %cst_21 [1] : vector<8x16x128xf32> to vector<8x128xf32>
    %c0_22 = arith.constant 0 : index
    %c0_23 = arith.constant 0 : index
    %29 = vector.load %arg4[%c0_22, %c0_23] : memref<128x128xf32, #tpu.memory_space<vmem>>, vector<128x128xf32>
    %cst_24 = arith.constant dense<0.000000e+00> : vector<8x128xf32>
    %30 = tpu.matmul %28, %29, %cst_24 {dimension_numbers = #tpu.dot_dimension_numbers<[1], [0], [0], [1], [0, 0, 1, 1], [], []>} : vector<8x128xf32>, vector<128x128xf32>, vector<8x128xf32> -> vector<8x128xf32>
    %c0_25 = arith.constant 0 : index
    %c0_26 = arith.constant 0 : index
    %31 = vector.load %arg5[%c0_25, %c0_26] : memref<1x128xf32, #tpu.memory_space<vmem>>, vector<1x128xf32>
    %32 = vector.broadcast %31 : vector<1x128xf32> to vector<8x128xf32>
    %33 = arith.addf %30, %32 : vector<8x128xf32>
    %34 = arith.mulf %33, %33 : vector<8x128xf32>
    %cst_27 = arith.constant dense<0.000000e+00> : vector<8xf32>
    %35 = vector.multi_reduction <add>, %34, %cst_27 [1] : vector<8x128xf32> to vector<8xf32>
    %36 = vector.shape_cast %35 : vector<8xf32> to vector<8x1xf32>
    %37 = math.rsqrt %36 : vector<8x1xf32>
    %38 = vector.broadcast %37 : vector<8x1xf32> to vector<8x128xf32>
    %39 = arith.mulf %33, %38 : vector<8x128xf32>
    %c0_28 = arith.constant 0 : index
    %c0_29 = arith.constant 0 : index
    %40 = vector.load %arg6[%c0_28, %c0_29] : memref<8x128xf32, #tpu.memory_space<vmem>>, vector<8x128xf32>
    tpu.vector_store %arg6[%c0_28, %c0_29], %39 {strides = array<i32>} : memref<8x128xf32, #tpu.memory_space<vmem>>, vector<8x128xf32>,
    return
  }
  func.func @transform_0(%arg0: i32) -> (i32, i32, i32) {
    %c0_i32 = arith.constant 0 : i32
    %c0_i32_0 = arith.constant 0 : i32
    %c0_i32_1 = arith.constant 0 : i32
    return %arg0, %c0_i32, %c0_i32_0 : i32, i32, i32
  }
  func.func @transform_1(%arg0: i32) -> (i32, i32, i32) {
    %c0_i32 = arith.constant 0 : i32
    %c0_i32_0 = arith.constant 0 : i32
    %c0_i32_1 = arith.constant 0 : i32
    %c0_i32_2 = arith.constant 0 : i32
    return %c0_i32, %c0_i32_0, %c0_i32_1 : i32, i32, i32
  }
  func.func @transform_2(%arg0: i32) -> (i32, i32) {
    %c0_i32 = arith.constant 0 : i32
    %c0_i32_0 = arith.constant 0 : i32
    %c0_i32_1 = arith.constant 0 : i32
    return %c0_i32, %c0_i32_0 : i32, i32
  }
  func.func @transform_3(%arg0: i32) -> (i32, i32) {
    %c0_i32 = arith.constant 0 : i32
    %c0_i32_0 = arith.constant 0 : i32
    %c0_i32_1 = arith.constant 0 : i32
    return %c0_i32, %c0_i32_0 : i32, i32
  }
  func.func @transform_4(%arg0: i32) -> (i32, i32) {
    %c0_i32 = arith.constant 0 : i32
    %c0_i32_0 = arith.constant 0 : i32
    %c0_i32_1 = arith.constant 0 : i32
    return %c0_i32, %c0_i32_0 : i32, i32
  }
  func.func @transform_5(%arg0: i32) -> (i32, i32) {
    %c0_i32 = arith.constant 0 : i32
    %c0_i32_0 = arith.constant 0 : i32
    return %arg0, %c0_i32 : i32, i32
  }
}

</mosaic_0001>

<bundles_post_ra>
// kernel: prototypical_forward.1
= control target key start
LH: loop header
LB: loop body
LE: loop exit
PB: predicated region body
PF: predicated region fallthrough
CT: control target
= control target key end

     0   :  { %vm71_vm0 = vcmask 588800   ;;  %vm3613_vm1 = vmmov 0   ;;  %vm2184_vm2 = vcmask 1041409   ;;  %vm2186_vm3 = vcmask 1042434   ;;  %s4263_s1 = inlined_call_operand.vmem [shape: f32[3,72,128], index: 1, kind: input, shape index: {}]   ;;  %s4264_s0 = inlined_call_operand.vmem [shape: f32[8,18,72], index: 0, kind: input, shape index: {}]   ;;  %s4265_s3 = inlined_call_operand.vmem [shape: f32[128,128], index: 3, kind: input, shape index: {}]   ;;  %s4266_s2 = inlined_call_operand.vmem [shape: f32[1,128], index: 2, kind: input, shape index: {}]   ;;  %s4267_s4 = inlined_call_operand.vmem [shape: f32[1,128], index: 4, kind: input, shape index: {}]   ;;  %s4268_s5 = inlined_call_operand.vmem [shape: f32[8,128], index: 5, kind: output, shape index: {}]  }
   0x1   :  { %v2279_v0 = vld [vmem:[%s4263_s1 + $0x48] sm:$0xff]  ;;  %v2280_v1 = vld [vmem:[%s4263_s1 + $0x50] sm:$0xff]  ;;  %v2281_v2 = vld [vmem:[%s4263_s1 + $0x58] sm:$0xff]  ;;  %vm2188_vm4 = vcmask 1043459   ;;  %vm2190_vm5 = vcmask 1044484   ;;  %vm2192_vm6 = vcmask 1045509  }
   0x2   :  { %v3654_v3 = vpack.c.bf16 %v2280_v1, %v2279_v0  ;;  %v2282_v4 = vld [vmem:[%s4263_s1 + $0x60] sm:$0xff]  ;;  %v2283_v6 = vld [vmem:[%s4263_s1 + $0x68] sm:$0xff]  ;;  %v2284_v7 = vld [vmem:[%s4263_s1 + $0x70] sm:$0xff]  ;;  %vm2194_vm7 = vcmask 1046534   ;;  %vm2196_vm8 = vcmask 1047559  }
   0x3   :  { %v3659_v5 = vpack.c.bf16 %v2282_v4, %v2281_v2  ;;  %v45_v8 = vld [vmem:[%s4264_s0 + $0x1] sm:$0xff]  ;;  %v49_v9 = vld [vmem:[%s4264_s0 + $0x31] sm:$0xff]  ;;  %v3679_v10 = vpack.c.bf16 %v2284_v7, %v2283_v6  ;;  %v46_v15 = vld [vmem:[%s4264_s0 + $0x9] sm:$0xff] }
   0x4   :  { %3168 = vmatprep.subr.bf16.mxu1 %v3654_v3  ;;  %3200 = vmatprep.subr.bf16.mxu0 %v3654_v3  ;;  %v2285_v11 = vld [vmem:[%s4263_s1 + $0x78] sm:$0xff]  ;;  %v2286_v12 = vld [vmem:[%s4263_s1 + $0x80] sm:$0xff]  ;;  %v3702_v14 = vld [vmem:[%s4263_s1 + $0x88] sm:$0xff] }
   0x5   :  { %3170 = vmatpush3.bf16.msra.mxu1 %v3654_v3  ;;  %3202 = vmatpush3.bf16.msra.mxu0 %v3654_v3  ;;  %v3693_v13 = vpack.c.bf16 %v2286_v12, %v2285_v11  ;;  %v50_v16 = vld [vmem:[%s4264_s0 + $0x39] sm:$0xff]  ;;  %v53_v18 = vld [vmem:[%s4264_s0 + $0x61] sm:$0xff]  ;;  %v54_v20 = vld [vmem:[%s4264_s0 + $0x69] sm:$0xff] }
   0x6   :  { %3172 = vmatprep.subr.bf16.mxu1 %v3659_v5  ;;  %3204 = vmatprep.subr.bf16.mxu0 %v3659_v5  ;;  %v47_v17 = vld [vmem:[%s4264_s0 + $0x19] sm:$0xff]  ;;  %v48_v19 = vld [vmem:[%s4264_s0 + $0x21] sm:$0xff]  ;;  %v51_v21 = vld [vmem:[%s4264_s0 + $0x49] sm:$0xff] }
   0x7   :  { %2646 = vmatprep.mubr.msk.f32.mxu1 %vm71_vm0, %v45_v8  ;;  %2688 = vmatprep.mubr.msk.f32.mxu0 %vm71_vm0, %v49_v9  ;;  %v57_v22 = vld [vmem:[%s4264_s0 + $0x91] sm:$0xff]  ;;  %v36_v23 = vld [vmem:[%s4263_s1] sm:$0xff]  ;;  %v37_v24 = vld [vmem:[%s4263_s1 + $0x8] sm:$0xff] }
   0x8   :  { %v52_v25 = vld [vmem:[%s4264_s0 + $0x51] sm:$0xff]  ;;  %v3795_v28 = vpack.c.bf16 %v37_v24, %v36_v23  ;;  %v58_v29 = vld [vmem:[%s4264_s0 + $0x99] sm:$0xff]  ;;  %v41_v32 = vld [vmem:[%s4263_s1 + $0x28] sm:$0xff] }
   0x9   :  { %3174 = vmatpush3.bf16.msra.mxu1 %v3659_v5  ;;  %3206 = vmatpush3.bf16.msra.mxu0 %v3659_v5  ;;  %v38_v26 = vld [vmem:[%s4263_s1 + $0x10] sm:$0xff]  ;;  %v39_v27 = vld [vmem:[%s4263_s1 + $0x18] sm:$0xff]  ;;  %v40_v31 = vld [vmem:[%s4263_s1 + $0x20] sm:$0xff] }
   0xa   :  { %3176 = vmatprep.subr.bf16.mxu1 %v3679_v10  ;;  %3208 = vmatprep.subr.bf16.mxu0 %v3679_v10  ;;  %v3803_v30 = vpack.c.bf16 %v39_v27, %v38_v26  ;;  %v55_v33 = vld [vmem:[%s4264_s0 + $0x79] sm:$0xff]  ;;  %v3824_v35 = vpack.c.bf16 %v41_v32, %v40_v31  ;;  %v42_v36 = vld [vmem:[%s4263_s1 + $0x30] sm:$0xff]  ;;  %v56_v40 = vld [vmem:[%s4264_s0 + $0x81] sm:$0xff] }
   0xb   :  { %v20_v34 = vld [vmem:[%s4264_s0] sm:$0xff]  ;;  %v43_v37 = vld [vmem:[%s4263_s1 + $0x38] sm:$0xff]  ;;  %v21_v41 = vld [vmem:[%s4264_s0 + $0x8] sm:$0xff] }
   0xc   :  { %v3838_v38 = vpack.c.bf16 %v43_v37, %v42_v36  ;;  %v3848_v39 = vld [vmem:[%s4263_s1 + $0x40] sm:$0xff]  ;;  %v59_v42 = vld [vmem:[%s4264_s0 + $0xa9] sm:$0xff]  ;;  %v60_v44 = vld [vmem:[%s4264_s0 + $0xb1] sm:$0xff] }
   0xd   :  { %3178 = vmatpush3.bf16.msra.mxu1 %v3679_v10  ;;  %3210 = vmatpush3.bf16.msra.mxu0 %v3679_v10  ;;  %v24_v43 = vld [vmem:[%s4264_s0 + $0x30] sm:$0xff]  ;;  %v25_v45 = vld [vmem:[%s4264_s0 + $0x38] sm:$0xff]  ;;  %v28_v47 = vld [vmem:[%s4264_s0 + $0x60] sm:$0xff] }
   0xe   :  { %3180 = vmatprep.subr.bf16.mxu1 %v3693_v13  ;;  %3212 = vmatprep.subr.bf16.mxu0 %v3693_v13  ;;  %v22_v46 = vld [vmem:[%s4264_s0 + $0x18] sm:$0xff]  ;;  %v23_v48 = vld [vmem:[%s4264_s0 + $0x20] sm:$0xff]  ;;  %v29_v49 = vld [vmem:[%s4264_s0 + $0x68] sm:$0xff] }
   0xf   :  { %v26_v50 = vld [vmem:[%s4264_s0 + $0x48] sm:$0xff]  ;;  %v32_v51 = vld [vmem:[%s4264_s0 + $0x90] sm:$0xff]  ;;  %v2321_v53 = vld [vmem:[%s4263_s1 + $0x98] sm:$0xff] }
  0x10   :  { %v2320_v52 = vld [vmem:[%s4263_s1 + $0x90] sm:$0xff]  ;;  %v2322_v55 = vld [vmem:[%s4263_s1 + $0xa0] sm:$0xff]  ;;  %v2323_v56 = vld [vmem:[%s4263_s1 + $0xa8] sm:$0xff] }
  0x11   :  { %3182 = vmatpush3.bf16.msra.mxu1 %v3693_v13  ;;  %3214 = vmatpush3.bf16.msra.mxu0 %v3693_v13  ;;  %v27_v54 = vld [vmem:[%s4264_s0 + $0x50] sm:$0xff]  ;;  %v3976_v57 = vpack.c.bf16 %v2321_v53, %v2320_v52  ;;  %v33_v58 = vld [vmem:[%s4264_s0 + $0x98] sm:$0xff]  ;;  %v3984_v59 = vpack.c.bf16 %v2323_v56, %v2322_v55  ;;  %v1368_v62 = vld [vmem:[%s4264_s0 + $0x2] sm:$0xff] }
  0x12   :  { %2644 = vmatprep.subr.mxu1 %v3702_v14  ;;  %2686 = vmatprep.subr.mxu0 %v3702_v14  ;;  %v2324_v60 = vld [vmem:[%s4263_s1 + $0xb0] sm:$0xff]  ;;  %v2325_v61 = vld [vmem:[%s4263_s1 + $0xb8] sm:$0xff]  ;;  %v2326_v1 = vld [vmem:[%s4263_s1 + $0xc0] sm:$0xff] }
  0x13   :  { %v30_v63 = vld [vmem:[%s4264_s0 + $0x78] sm:$0xff]  ;;  %v4005_v0 = vpack.c.bf16 %v2325_v61, %v2324_v60  ;;  %v2327_v2 = vld [vmem:[%s4263_s1 + $0xc8] sm:$0xff]  ;;  %v4029_v4 = vld [vmem:[%s4263_s1 + $0xd0] sm:$0xff] }
  0x14   :  { %v1369_v6 = vld [vmem:[%s4264_s0 + $0xa] sm:$0xff]  ;;  %v1372_v7 = vld [vmem:[%s4264_s0 + $0x32] sm:$0xff]  ;;  %v1370_v11 = vld [vmem:[%s4264_s0 + $0x1a] sm:$0xff] }
  0x15   :  { %2645 = vmatpush3.msra.mxu1 %v3702_v14  ;;  %2687 = vmatpush3.msra.mxu0 %v3702_v14  ;;  %v34_v8 = vld [vmem:[%s4264_s0 + $0xa8] sm:$0xff]  ;;  %v35_v9 = vld [vmem:[%s4264_s0 + $0xb0] sm:$0xff]  ;;  %v2157_v32 = vld [vmem:[%s4265_s3 + $0x20] sm:$0xff] }
  0x16   :  { %2647 = vmatmul.mubr.msk.f32.vlgmr.msra.gmra.mrb[0].mxu1 %vm71_vm0, %v46_v15  ;;  %3184 = vmatprep.subr.bf16.mxu1 %v3654_v3  ;;  %v1376_v12 = vld [vmem:[%s4264_s0 + $0x62] sm:$0xff]  ;;  %v1374_v15 = vld [vmem:[%s4264_s0 + $0x4a] sm:$0xff]  ;;  %v1383_v24 = vld [vmem:[%s4264_s0 + $0xb2] sm:$0xff] }
  0x17   :  { %3232 = vmatprep.subr.bf16.mxu0 %v3654_v3  ;;  %3186 = vmatpush3.bf16.msra.mxu1 %v3654_v3  ;;  %v2154_v26 = vld [vmem:[%s4265_s3 + $0x8] sm:$0xff]  ;;  %v2160_v36 = vld [vmem:[%s4265_s3 + $0x38] sm:$0xff]  ;;  %v4239_v52 = vld [vmem:[%s4266_s2] ss:$0 sm:$0xff] }
  0x18   :  { %2689 = vmatmul.mubr.msk.f32.vlgmr.msra.gmra.mrb[0].mxu0 %vm71_vm0, %v50_v16  ;;  %3188 = vmatprep.subr.bf16.mxu1 %v3659_v5  ;;  %v1380_v16 = vld [vmem:[%s4264_s0 + $0x92] sm:$0xff] }
  0x19   :  { %3234 = vmatpush3.bf16.msra.mxu0 %v3654_v3  ;;  %2667 = vmatprep.mubr.msk.f32.mxu1 %vm71_vm0, %v47_v17  ;;  %v1375_v17 = vld [vmem:[%s4264_s0 + $0x52] sm:$0xff] }
  0x1a   :  { %3236 = vmatprep.subr.bf16.mxu0 %v3659_v5  ;;  %2730 = vmatprep.mubr.msk.f32.mxu0 %vm71_vm0, %v53_v18  ;;  %v1381_v18 = vld [vmem:[%s4264_s0 + $0x9a] sm:$0xff] }
  0x1b   :  { %3190 = vmatpush3.bf16.msra.mxu1 %v3659_v5 }
  0x1c   :  { %3192 = vmatprep.subr.bf16.mxu1 %v3679_v10 }
  0x1d   :  { %3238 = vmatpush3.bf16.msra.mxu0 %v3659_v5 }
  0x1e   :  { %3240 = vmatprep.subr.bf16.mxu0 %v3679_v10 }
  0x1f   :  { %3194 = vmatpush3.bf16.msra.mxu1 %v3679_v10 }
  0x20   :  { %3196 = vmatprep.subr.bf16.mxu1 %v3693_v13 }
  0x21   :  { %3242 = vmatpush3.bf16.msra.mxu0 %v3679_v10 }
  0x22   :  { %3244 = vmatprep.subr.bf16.mxu0 %v3693_v13 }
  0x23   :  { %3198 = vmatpush3.bf16.msra.mxu1 %v3693_v13 }
  0x24   :  { %2665 = vmatprep.subr.mxu1 %v3702_v14 }
  0x25   :  { %3246 = vmatpush3.bf16.msra.mxu0 %v3693_v13 }
  0x26   :  { %2728 = vmatprep.subr.mxu0 %v3702_v14 }
  0x27   :  { %2666 = vmatpush3.msra.mxu1 %v3702_v14 }
  0x28   :  { %3216 = vmatprep.subr.bf16.mxu1 %v3654_v3  ;;  %2668 = vmatmul.mubr.msk.f32.vlgmr.msra.gmra.mrb[2].mxu1 %vm71_vm0, %v48_v19  ;;  %v1378_v19 = vld [vmem:[%s4264_s0 + $0x7a] sm:$0xff] }
  0x29   :  { %2729 = vmatpush3.msra.mxu0 %v3702_v14  ;;  %3218 = vmatpush3.bf16.msra.mxu1 %v3654_v3 }
  0x2a   :  { %3264 = vmatprep.subr.bf16.mxu0 %v3654_v3  ;;  %2731 = vmatmul.mubr.msk.f32.vlgmr.msra.gmra.mrb[2].mxu0 %vm71_vm0, %v54_v20  ;;  %v1379_v20 = vld [vmem:[%s4264_s0 + $0x82] sm:$0xff] }
  0x2b   :  { %3266 = vmatpush3.bf16.msra.mxu0 %v3654_v3  ;;  %3220 = vmatprep.subr.bf16.mxu1 %v3659_v5 }
  0x2c   :  { %3268 = vmatprep.subr.bf16.mxu0 %v3659_v5  ;;  %2709 = vmatprep.mubr.msk.f32.mxu1 %vm71_vm0, %v51_v21  ;;  %v1382_v21 = vld [vmem:[%s4264_s0 + $0xaa] sm:$0xff] }
  0x2d   :  { %3222 = vmatpush3.bf16.msra.mxu1 %v3659_v5  ;;  %2772 = vmatprep.mubr.msk.f32.mxu0 %vm71_vm0, %v57_v22 }
  0x2e   :  { %3224 = vmatprep.subr.bf16.mxu1 %v3679_v10 }
  0x2f   :  { %3270 = vmatpush3.bf16.msra.mxu0 %v3659_v5 }
  0x30   :  { %3272 = vmatprep.subr.bf16.mxu0 %v3679_v10 }
  0x31   :  { %3226 = vmatpush3.bf16.msra.mxu1 %v3679_v10 }
  0x32   :  { %3228 = vmatprep.subr.bf16.mxu1 %v3693_v13 }
  0x33   :  { %3274 = vmatpush3.bf16.msra.mxu0 %v3679_v10 }
  0x34   :  { %3276 = vmatprep.subr.bf16.mxu0 %v3693_v13 }
  0x35   :  { %3230 = vmatpush3.bf16.msra.mxu1 %v3693_v13 }
  0x36   :  { %2707 = vmatprep.subr.mxu1 %v3702_v14 }
  0x37   :  { %3278 = vmatpush3.bf16.msra.mxu0 %v3693_v13 }
  0x38   :  { %2770 = vmatprep.subr.mxu0 %v3702_v14 }
  0x39   :  { %2708 = vmatpush3.msra.mxu1 %v3702_v14 }
  0x3a   :  { %3248 = vmatprep.subr.bf16.mxu1 %v3654_v3  ;;  %2710 = vmatmul.mubr.msk.f32.vlgmr.msra.gmra.mrb[4].mxu1 %vm71_vm0, %v52_v25  ;;  %v2153_v25 = vld [vmem:[%s4265_s3] sm:$0xff] }
  0x3b   :  { %2771 = vmatpush3.msra.mxu0 %v3702_v14  ;;  %3250 = vmatpush3.bf16.msra.mxu1 %v3654_v3  ;;  %v3552_v27 = vpack.c.bf16 %v2154_v26, %v2153_v25 }
  0x3c   :  { %3296 = vmatprep.subr.bf16.mxu0 %v3795_v28  ;;  %2773 = vmatmul.mubr.msk.f32.vlgmr.msra.gmra.mrb[4].mxu0 %vm71_vm0, %v58_v29  ;;  %v2155_v29 = vld [vmem:[%s4265_s3 + $0x10] sm:$0xff] }
  0x3d   :  { %3298 = vmatpush3.bf16.msra.mxu0 %v3795_v28  ;;  %3252 = vmatprep.subr.bf16.mxu1 %v3659_v5 }
  0x3e   :  { %3300 = vmatprep.subr.bf16.mxu0 %v3803_v30  ;;  %2751 = vmatprep.mubr.msk.f32.mxu1 %vm71_vm0, %v55_v33  ;;  %v2158_v33 = vld [vmem:[%s4265_s3 + $0x28] sm:$0xff] }
  0x3f   :  { %3254 = vmatpush3.bf16.msra.mxu1 %v3659_v5  ;;  %2814 = vmatprep.mubr.msk.f32.mxu0 %vm71_vm0, %v20_v34  ;;  %v3558_v34 = vpack.c.bf16 %v2158_v33, %v2157_v32 }
  0x40   :  { %3256 = vmatprep.subr.bf16.mxu1 %v3679_v10 }
  0x41   :  { %3302 = vmatpush3.bf16.msra.mxu0 %v3803_v30 }
  0x42   :  { %3304 = vmatprep.subr.bf16.mxu0 %v3824_v35 }
  0x43   :  { %3258 = vmatpush3.bf16.msra.mxu1 %v3679_v10 }
  0x44   :  { %3260 = vmatprep.subr.bf16.mxu1 %v3693_v13 }
  0x45   :  { %3306 = vmatpush3.bf16.msra.mxu0 %v3824_v35 }
  0x46   :  { %3308 = vmatprep.subr.bf16.mxu0 %v3838_v38 }
  0x47   :  { %3262 = vmatpush3.bf16.msra.mxu1 %v3693_v13 }
  0x48   :  { %2749 = vmatprep.subr.mxu1 %v3702_v14 }
  0x49   :  { %3310 = vmatpush3.bf16.msra.mxu0 %v3838_v38 }
  0x4a   :  { %2812 = vmatprep.subr.mxu0 %v3848_v39 }
  0x4b   :  { %2750 = vmatpush3.msra.mxu1 %v3702_v14 }
  0x4c   :  { %3280 = vmatprep.subr.bf16.mxu1 %v3654_v3  ;;  %2752 = vmatmul.mubr.msk.f32.vlgmr.msra.gmra.mrb[6].mxu1 %vm71_vm0, %v56_v40 }
  0x4d   :  { %2813 = vmatpush3.msra.mxu0 %v3848_v39  ;;  %3282 = vmatpush3.bf16.msra.mxu1 %v3654_v3  ;;  %v4019_v3 = vpack.c.bf16 %v2327_v2, %v2326_v1 }
  0x4e   :  { %3328 = vmatprep.subr.bf16.mxu0 %v3795_v28  ;;  %2815 = vmatmul.mubr.msk.f32.vlgmr.msra.gmra.mrb[6].mxu0 %vm71_vm0, %v21_v41  ;;  %v2163_v41 = vld [vmem:[%s4265_s3 + $0x50] sm:$0xff] }
  0x4f   :  { %3330 = vmatpush3.bf16.msra.mxu0 %v3795_v28  ;;  %3284 = vmatprep.subr.bf16.mxu1 %v3659_v5 }
  0x50   :  { %3332 = vmatprep.subr.bf16.mxu0 %v3803_v30  ;;  %2793 = vmatprep.mubr.msk.f32.mxu1 %vm71_vm0, %v59_v42  ;;  %v2164_v42 = vld [vmem:[%s4265_s3 + $0x58] sm:$0xff] }
  0x51   :  { %3286 = vmatpush3.bf16.msra.mxu1 %v3659_v5  ;;  %2856 = vmatprep.mubr.msk.f32.mxu0 %vm71_vm0, %v24_v43  ;;  %v31_v5 = vld [vmem:[%s4264_s0 + $0x80] sm:$0xff]  ;;  %v3567_v43 = vpack.c.bf16 %v2164_v42, %v2163_v41 }
  0x52   :  { %3288 = vmatprep.subr.bf16.mxu1 %v3679_v10 }
  0x53   :  { %3334 = vmatpush3.bf16.msra.mxu0 %v3803_v30 }
  0x54   :  { %3336 = vmatprep.subr.bf16.mxu0 %v3824_v35 }
  0x55   :  { %3290 = vmatpush3.bf16.msra.mxu1 %v3679_v10  ;;  %v1373_v10 = vld [vmem:[%s4264_s0 + $0x3a] sm:$0xff] }
  0x56   :  { %3292 = vmatprep.subr.bf16.mxu1 %v3693_v13 }
  0x57   :  { %3338 = vmatpush3.bf16.msra.mxu0 %v3824_v35 }
  0x58   :  { %3340 = vmatprep.subr.bf16.mxu0 %v3838_v38 }
  0x59   :  { %3294 = vmatpush3.bf16.msra.mxu1 %v3693_v13  ;;  %v1371_v13 = vld [vmem:[%s4264_s0 + $0x22] sm:$0xff] }
  0x5a   :  { %2791 = vmatprep.subr.mxu1 %v3702_v14 }
  0x5b   :  { %3342 = vmatpush3.bf16.msra.mxu0 %v3838_v38 }
  0x5c   :  { %2854 = vmatprep.subr.mxu0 %v3848_v39 }
  0x5d   :  { %2792 = vmatpush3.msra.mxu1 %v3702_v14  ;;  %v1377_v14 = vld [vmem:[%s4264_s0 + $0x6a] sm:$0xff] }
  0x5e   :  { %3312 = vmatprep.subr.bf16.mxu1 %v3795_v28  ;;  %2794 = vmatmul.mubr.msk.f32.vlgmr.msra.gmra.mrb[8].mxu1 %vm71_vm0, %v60_v44  ;;  %v2165_v44 = vld [vmem:[%s4265_s3 + $0x60] sm:$0xff] }
  0x5f   :  { %2855 = vmatpush3.msra.mxu0 %v3848_v39  ;;  %3314 = vmatpush3.bf16.msra.mxu1 %v3795_v28 }
  0x60   :  { %3360 = vmatprep.subr.bf16.mxu0 %v3795_v28  ;;  %2857 = vmatmul.mubr.msk.f32.vlgmr.msra.gmra.mrb[0].mxu0 %vm71_vm0, %v25_v45  ;;  %v2166_v45 = vld [vmem:[%s4265_s3 + $0x68] sm:$0xff] }
  0x61   :  { %3362 = vmatpush3.bf16.msra.mxu0 %v3795_v28  ;;  %3316 = vmatprep.subr.bf16.mxu1 %v3803_v30 }
  0x62   :  { %3364 = vmatprep.subr.bf16.mxu0 %v3803_v30  ;;  %2835 = vmatprep.mubr.msk.f32.mxu1 %vm71_vm0, %v22_v46  ;;  %v3570_v46 = vpack.c.bf16 %v2166_v45, %v2165_v44 }
  0x63   :  { %3318 = vmatpush3.bf16.msra.mxu1 %v3803_v30  ;;  %2898 = vmatprep.mubr.msk.f32.mxu0 %vm71_vm0, %v28_v47  ;;  %v2167_v47 = vld [vmem:[%s4265_s3 + $0x70] sm:$0xff] }
  0x64   :  { %3320 = vmatprep.subr.bf16.mxu1 %v3824_v35 }
  0x65   :  { %3366 = vmatpush3.bf16.msra.mxu0 %v3803_v30 }
  0x66   :  { %3368 = vmatprep.subr.bf16.mxu0 %v3824_v35 }
  0x67   :  { %3322 = vmatpush3.bf16.msra.mxu1 %v3824_v35 }
  0x68   :  { %3324 = vmatprep.subr.bf16.mxu1 %v3838_v38 }
  0x69   :  { %3370 = vmatpush3.bf16.msra.mxu0 %v3824_v35 }
  0x6a   :  { %3372 = vmatprep.subr.bf16.mxu0 %v3838_v38 }
  0x6b   :  { %3326 = vmatpush3.bf16.msra.mxu1 %v3838_v38 }
  0x6c   :  { %2833 = vmatprep.subr.mxu1 %v3848_v39 }
  0x6d   :  { %3374 = vmatpush3.bf16.msra.mxu0 %v3838_v38 }
  0x6e   :  { %2896 = vmatprep.subr.mxu0 %v3848_v39 }
  0x6f   :  { %2834 = vmatpush3.msra.mxu1 %v3848_v39 }
  0x70   :  { %3344 = vmatprep.subr.bf16.mxu1 %v3795_v28  ;;  %2836 = vmatmul.mubr.msk.f32.vlgmr.msra.gmra.mrb[2].mxu1 %vm71_vm0, %v23_v48  ;;  %v2168_v48 = vld [vmem:[%s4265_s3 + $0x78] sm:$0xff] }
  0x71   :  { %2897 = vmatpush3.msra.mxu0 %v3848_v39  ;;  %3346 = vmatpush3.bf16.msra.mxu1 %v3795_v28 }
  0x72   :  { %3392 = vmatprep.subr.bf16.mxu0 %v3795_v28  ;;  %2899 = vmatmul.mubr.msk.f32.vlgmr.msra.gmra.mrb[2].mxu0 %vm71_vm0, %v29_v49  ;;  %v3573_v49 = vpack.c.bf16 %v2168_v48, %v2167_v47 }
  0x73   :  { %3394 = vmatpush3.bf16.msra.mxu0 %v3795_v28  ;;  %3348 = vmatprep.subr.bf16.mxu1 %v3803_v30 }
  0x74   :  { %3396 = vmatprep.subr.bf16.mxu0 %v3803_v30  ;;  %2877 = vmatprep.mubr.msk.f32.mxu1 %vm71_vm0, %v26_v50  ;;  %v3614_v50 = vmov 0.0  }
  0x75   :  { %3350 = vmatpush3.bf16.msra.mxu1 %v3803_v30  ;;  %2940 = vmatprep.mubr.msk.f32.mxu0 %vm71_vm0, %v32_v51 }
  0x76   :  { %3352 = vmatprep.subr.bf16.mxu1 %v3824_v35 }
  0x77   :  { %3398 = vmatpush3.bf16.msra.mxu0 %v3803_v30 }
  0x78   :  { %3400 = vmatprep.subr.bf16.mxu0 %v3824_v35 }
  0x79   :  { %3354 = vmatpush3.bf16.msra.mxu1 %v3824_v35 }
  0x7a   :  { %3356 = vmatprep.subr.bf16.mxu1 %v3838_v38 }
  0x7b   :  { %3402 = vmatpush3.bf16.msra.mxu0 %v3824_v35 }
  0x7c   :  { %3404 = vmatprep.subr.bf16.mxu0 %v3838_v38 }
  0x7d   :  { %3358 = vmatpush3.bf16.msra.mxu1 %v3838_v38 }
  0x7e   :  { %2875 = vmatprep.subr.mxu1 %v3848_v39 }
  0x7f   :  { %3406 = vmatpush3.bf16.msra.mxu0 %v3838_v38 }
  0x80   :  { %2938 = vmatprep.subr.mxu0 %v3848_v39 }
  0x81   :  { %2876 = vmatpush3.msra.mxu1 %v3848_v39 }
  0x82   :  { %3376 = vmatprep.subr.bf16.mxu1 %v3795_v28  ;;  %2878 = vmatmul.mubr.msk.f32.vlgmr.msra.gmra.mrb[4].mxu1 %vm71_vm0, %v27_v54 }
  0x83   :  { %2939 = vmatpush3.msra.mxu0 %v3848_v39  ;;  %3378 = vmatpush3.bf16.msra.mxu1 %v3795_v28 }
  0x84   :  { %3424 = vmatprep.subr.bf16.mxu0 %v3976_v57  ;;  %2941 = vmatmul.mubr.msk.f32.vlgmr.msra.gmra.mrb[4].mxu0 %vm71_vm0, %v33_v58 }
  0x85   :  { %3426 = vmatpush3.bf16.msra.mxu0 %v3976_v57  ;;  %3380 = vmatprep.subr.bf16.mxu1 %v3803_v30 }
  0x86   :  { %3428 = vmatprep.subr.bf16.mxu0 %v3984_v59  ;;  %2982 = vmatprep.mubr.msk.f32.mxu0 %vm71_vm0, %v1368_v62 }
  0x87   :  { %3382 = vmatpush3.bf16.msra.mxu1 %v3803_v30  ;;  %2919 = vmatprep.mubr.msk.f32.mxu1 %vm71_vm0, %v30_v63 }
  0x88   :  { %3384 = vmatprep.subr.bf16.mxu1 %v3824_v35 }
  0x89   :  { %3430 = vmatpush3.bf16.msra.mxu0 %v3984_v59 }
  0x8a   :  { %3432 = vmatprep.subr.bf16.mxu0 %v4005_v0 }
  0x8b   :  { %3386 = vmatpush3.bf16.msra.mxu1 %v3824_v35 }
  0x8c   :  { %3388 = vmatprep.subr.bf16.mxu1 %v3838_v38 }
  0x8d   :  { %3434 = vmatpush3.bf16.msra.mxu0 %v4005_v0 }
  0x8e   :  { %3436 = vmatprep.subr.bf16.mxu0 %v4019_v3 }
  0x8f   :  { %3390 = vmatpush3.bf16.msra.mxu1 %v3838_v38 }
  0x90   :  { %2917 = vmatprep.subr.mxu1 %v3848_v39 }
  0x91   :  { %3438 = vmatpush3.bf16.msra.mxu0 %v4019_v3 }
  0x92   :  { %2980 = vmatprep.subr.mxu0 %v4029_v4 }
  0x93   :  { %2918 = vmatpush3.msra.mxu1 %v3848_v39 }
  0x94   :  { %3408 = vmatprep.subr.bf16.mxu1 %v3795_v28  ;;  %2920 = vmatmul.mubr.msk.f32.vlgmr.msra.gmra.mrb[6].mxu1 %vm71_vm0, %v31_v5 }
  0x95   :  { %2981 = vmatpush3.msra.mxu0 %v4029_v4  ;;  %3410 = vmatpush3.bf16.msra.mxu1 %v3795_v28  ;;  %v3612_v28 = vmov 0.0|0.0  }
  0x96   :  { %2983 = vmatmul.mubr.msk.f32.vlgmr.msra.gmra.mrb[6].mxu0 %vm71_vm0, %v1369_v6  ;;  %3456 = vmatprep.subr.bf16.mxu0 %v3976_v57 }
  0x97   :  { %3458 = vmatpush3.bf16.msra.mxu0 %v3976_v57  ;;  %3412 = vmatprep.subr.bf16.mxu1 %v3803_v30 }
  0x98   :  { %3460 = vmatprep.subr.bf16.mxu0 %v3984_v59  ;;  %3024 = vmatprep.mubr.msk.f32.mxu0 %vm71_vm0, %v1372_v7 }
  0x99   :  { %3414 = vmatpush3.bf16.msra.mxu1 %v3803_v30  ;;  %2961 = vmatprep.mubr.msk.f32.mxu1 %vm71_vm0, %v34_v8  ;;  %v2156_v30 = vld [vmem:[%s4265_s3 + $0x18] sm:$0xff] }
  0x9a   :  { %3416 = vmatprep.subr.bf16.mxu1 %v3824_v35  ;;  %v3555_v31 = vpack.c.bf16 %v2156_v30, %v2155_v29 }
  0x9b   :  { %3462 = vmatpush3.bf16.msra.mxu0 %v3984_v59 }
  0x9c   :  { %3464 = vmatprep.subr.bf16.mxu0 %v4005_v0 }
  0x9d   :  { %3418 = vmatpush3.bf16.msra.mxu1 %v3824_v35  ;;  %v2159_v35 = vld [vmem:[%s4265_s3 + $0x30] sm:$0xff] }
  0x9e   :  { %3420 = vmatprep.subr.bf16.mxu1 %v3838_v38  ;;  %v3561_v37 = vpack.c.bf16 %v2160_v36, %v2159_v35 }
  0x9f   :  { %3466 = vmatpush3.bf16.msra.mxu0 %v4005_v0 }
  0xa0   :  { %3468 = vmatprep.subr.bf16.mxu0 %v4019_v3 }
  0xa1   :  { %3422 = vmatpush3.bf16.msra.mxu1 %v3838_v38  ;;  %v2161_v38 = vld [vmem:[%s4265_s3 + $0x40] sm:$0xff] }
  0xa2   :  { %2959 = vmatprep.subr.mxu1 %v3848_v39 }
  0xa3   :  { %3470 = vmatpush3.bf16.msra.mxu0 %v4019_v3 }
  0xa4   :  { %3022 = vmatprep.subr.mxu0 %v4029_v4 }
  0xa5   :  { %2960 = vmatpush3.msra.mxu1 %v3848_v39  ;;  %v2162_v39 = vld [vmem:[%s4265_s3 + $0x48] sm:$0xff] }
  0xa6   :  { %3440 = vmatprep.subr.bf16.mxu1 %v3976_v57  ;;  %2962 = vmatmul.mubr.msk.f32.vlgmr.msra.gmra.mrb[8].mxu1 %vm71_vm0, %v35_v9  ;;  %v3564_v40 = vpack.c.bf16 %v2162_v39, %v2161_v38 }
  0xa7   :  { %3023 = vmatpush3.msra.mxu0 %v4029_v4  ;;  %3442 = vmatpush3.bf16.msra.mxu1 %v3976_v57 }
  0xa8   :  { %3025 = vmatmul.mubr.msk.f32.vlgmr.msra.gmra.mrb[0].mxu0 %vm71_vm0, %v1373_v10  ;;  %3488 = vmatprep.subr.bf16.mxu0 %v3976_v57 }
  0xa9   :  { %3490 = vmatpush3.bf16.msra.mxu0 %v3976_v57  ;;  %3444 = vmatprep.subr.bf16.mxu1 %v3984_v59 }
  0xaa   :  { %3492 = vmatprep.subr.bf16.mxu0 %v3984_v59  ;;  %3003 = vmatprep.mubr.msk.f32.mxu1 %vm71_vm0, %v1370_v11 }
  0xab   :  { %3446 = vmatpush3.bf16.msra.mxu1 %v3984_v59  ;;  %3066 = vmatprep.mubr.msk.f32.mxu0 %vm71_vm0, %v1376_v12 }
  0xac   :  { %3448 = vmatprep.subr.bf16.mxu1 %v4005_v0 }
  0xad   :  { %3494 = vmatpush3.bf16.msra.mxu0 %v3984_v59 }
  0xae   :  { %3496 = vmatprep.subr.bf16.mxu0 %v4005_v0 }
  0xaf   :  { %3450 = vmatpush3.bf16.msra.mxu1 %v4005_v0 }
  0xb0   :  { %3452 = vmatprep.subr.bf16.mxu1 %v4019_v3 }
  0xb1   :  { %3498 = vmatpush3.bf16.msra.mxu0 %v4005_v0 }
  0xb2   :  { %3500 = vmatprep.subr.bf16.mxu0 %v4019_v3 }
  0xb3   :  { %3454 = vmatpush3.bf16.msra.mxu1 %v4019_v3 }
  0xb4   :  { %3001 = vmatprep.subr.mxu1 %v4029_v4 }
  0xb5   :  { %3502 = vmatpush3.bf16.msra.mxu0 %v4019_v3 }
  0xb6   :  { %3064 = vmatprep.subr.mxu0 %v4029_v4 }
  0xb7   :  { %3002 = vmatpush3.msra.mxu1 %v4029_v4 }
  0xb8   :  { %3004 = vmatmul.mubr.msk.f32.vlgmr.msra.gmra.mrb[2].mxu1 %vm71_vm0, %v1371_v13  ;;  %3472 = vmatprep.subr.bf16.mxu1 %v3976_v57 }
  0xb9   :  { %3065 = vmatpush3.msra.mxu0 %v4029_v4  ;;  %3474 = vmatpush3.bf16.msra.mxu1 %v3976_v57 }
  0xba   :  { %3067 = vmatmul.mubr.msk.f32.vlgmr.msra.gmra.mrb[2].mxu0 %vm71_vm0, %v1377_v14  ;;  %3520 = vmatprep.subr.bf16.mxu0 %v3976_v57 }
  0xbb   :  { %3522 = vmatpush3.bf16.msra.mxu0 %v3976_v57  ;;  %3476 = vmatprep.subr.bf16.mxu1 %v3984_v59 }
  0xbc   :  { %3524 = vmatprep.subr.bf16.mxu0 %v3984_v59  ;;  %3045 = vmatprep.mubr.msk.f32.mxu1 %vm71_vm0, %v1374_v15 }
  0xbd   :  { %3478 = vmatpush3.bf16.msra.mxu1 %v3984_v59  ;;  %3108 = vmatprep.mubr.msk.f32.mxu0 %vm71_vm0, %v1380_v16 }
  0xbe   :  { %3480 = vmatprep.subr.bf16.mxu1 %v4005_v0 }
  0xbf   :  { %3526 = vmatpush3.bf16.msra.mxu0 %v3984_v59 }
  0xc0   :  { %3528 = vmatprep.subr.bf16.mxu0 %v4005_v0 }
  0xc1   :  { %3482 = vmatpush3.bf16.msra.mxu1 %v4005_v0 }
  0xc2   :  { %3484 = vmatprep.subr.bf16.mxu1 %v4019_v3 }
  0xc3   :  { %3530 = vmatpush3.bf16.msra.mxu0 %v4005_v0 }
  0xc4   :  { %3532 = vmatprep.subr.bf16.mxu0 %v4019_v3 }
  0xc5   :  { %3486 = vmatpush3.bf16.msra.mxu1 %v4019_v3 }
  0xc6   :  { %3043 = vmatprep.subr.mxu1 %v4029_v4 }
  0xc7   :  { %3534 = vmatpush3.bf16.msra.mxu0 %v4019_v3 }
  0xc8   :  { %3106 = vmatprep.subr.mxu0 %v4029_v4 }
  0xc9   :  { %3044 = vmatpush3.msra.mxu1 %v4029_v4 }
  0xca   :  { %3046 = vmatmul.mubr.msk.f32.vlgmr.msra.gmra.mrb[4].mxu1 %vm71_vm0, %v1375_v17  ;;  %3504 = vmatprep.subr.bf16.mxu1 %v3976_v57 }
  0xcb   :  { %3107 = vmatpush3.msra.mxu0 %v4029_v4  ;;  %3506 = vmatpush3.bf16.msra.mxu1 %v3976_v57 }
  0xcc   :  { %3109 = vmatmul.mubr.msk.f32.vlgmr.msra.gmra.mrb[4].mxu0 %vm71_vm0, %v1381_v18  ;;  %3508 = vmatprep.subr.bf16.mxu1 %v3984_v59 }
  0xcd   :  { %3087 = vmatprep.mubr.msk.f32.mxu1 %vm71_vm0, %v1378_v19  ;;  %3551 = vmatprep.subr.bf16.mxu0 %v3612_v28 }
  0xce   :  { %3553 = vmatpush3.bf16.msra.mxu0 %v3552_v27  ;;  %3164 = vmatprep.mubr.msk.f32.mxu0 %vm3613_vm1, %v3614_v50 }
  0xcf   :  { %3510 = vmatpush3.bf16.msra.mxu1 %v3984_v59  ;;  %3554 = vmatprep.subr.bf16.mxu0 %v3612_v28 }
  0xd0   :  { %3512 = vmatprep.subr.bf16.mxu1 %v4005_v0 }
  0xd2   :  { %3556 = vmatpush3.bf16.msra.mxu0 %v3555_v31 }
  0xd3   :  { %3514 = vmatpush3.bf16.msra.mxu1 %v4005_v0  ;;  %3557 = vmatprep.subr.bf16.mxu0 %v3612_v28 }
  0xd4   :  { %3516 = vmatprep.subr.bf16.mxu1 %v4019_v3 }
  0xd6   :  { %3559 = vmatpush3.bf16.msra.mxu0 %v3558_v34 }
  0xd7   :  { %3518 = vmatpush3.bf16.msra.mxu1 %v4019_v3  ;;  %3560 = vmatprep.subr.bf16.mxu0 %v3612_v28 }
  0xd8   :  { %3085 = vmatprep.subr.mxu1 %v4029_v4 }
  0xda   :  { %3562 = vmatpush3.bf16.msra.mxu0 %v3561_v37 }
  0xdb   :  { %3086 = vmatpush3.msra.mxu1 %v4029_v4  ;;  %3563 = vmatprep.subr.bf16.mxu0 %v3612_v28 }
  0xdc   :  { %3088 = vmatmul.mubr.msk.f32.vlgmr.msra.gmra.mrb[6].mxu1 %vm71_vm0, %v1379_v20  ;;  %3536 = vmatprep.subr.bf16.mxu1 %v3976_v57 }
  0xdd   :  { %3538 = vmatpush3.bf16.msra.mxu1 %v3976_v57  ;;  %3129 = vmatprep.mubr.msk.f32.mxu1 %vm71_vm0, %v1382_v21 }
  0xde   :  { %3540 = vmatprep.subr.bf16.mxu1 %v3984_v59  ;;  %3565 = vmatpush3.bf16.msra.mxu0 %v3564_v40 }
  0xdf   :  { %3566 = vmatprep.subr.bf16.mxu0 %v3612_v28 }
  0xe1   :  { %3542 = vmatpush3.bf16.msra.mxu1 %v3984_v59 }
  0xe2   :  { %3544 = vmatprep.subr.bf16.mxu1 %v4005_v0  ;;  %3568 = vmatpush3.bf16.msra.mxu0 %v3567_v43 }
  0xe3   :  { %3569 = vmatprep.subr.bf16.mxu0 %v3612_v28 }
  0xe5   :  { %3546 = vmatpush3.bf16.msra.mxu1 %v4005_v0 }
  0xe6   :  { %3548 = vmatprep.subr.bf16.mxu1 %v4019_v3  ;;  %3571 = vmatpush3.bf16.msra.mxu0 %v3570_v46 }
  0xe7   :  { %3572 = vmatprep.subr.bf16.mxu0 %v3612_v28 }
  0xe9   :  { %v2648_v22 = vpop.f32.mrb[0].mxu1  ;;  %3550 = vmatpush3.bf16.msra.mxu1 %v4019_v3 }
  0xea   :  { %v144_v23 = vpop.f32.mrb[1].mxu1  ;;  %3127 = vmatprep.subr.mxu1 %v4029_v4  ;;  %3574 = vmatpush3.bf16.msra.mxu0 %v3573_v49 }
  0xed   :  { %3128 = vmatpush3.msra.mxu1 %v4029_v4 }
  0xee   :  { %3130 = vmatmul.mubr.msk.f32.vlgmr.msra.gmra.mrb[8].mxu1 %vm71_vm0, %v1383_v24 }
 0x169   :  { %v2984_v51 = vpop.f32.mrb[6].mxu0 }
 0x16a   :  { %v3575_v53 = vadd.f32 %v2984_v51, %v2648_v22  ;;  %v1466_v54 = vpop.f32.mrb[7].mxu0 }
 0x16b   :  { %v3576_v55 = vadd.f32 %v1466_v54, %v144_v23 }
 0x16c   :  { %v2066_v56 = vadd.f32 %v3575_v53, %v4239_v52 }
 0x16d   :  { %v2065_v57 = vadd.f32 %v3576_v55, %v4239_v52 }
 0x16e   :  { %v2082_v58 = vmax.f32 %v2066_v56, 0.0 }
 0x16f   :  { %v2081_v59 = vmax.f32 %v2065_v57, 0.0 }
 0x171   :  { %v2097_v60 = vadd.f32 %v2082_v58, %v2081_v59 }
 0x173   :  { %v2098_v4 = vrot.slane %v2097_v60, 4 }
 0x175   :  { %v2099_v9 = vadd.f32 %v2098_v4, %v2097_v60 }
 0x177   :  { %v2100_v19 = vrot.slane %v2099_v9, 2 }
 0x179   :  { %v2101_v25 = vadd.f32 %v2100_v19, %v2099_v9 }
 0x17b   :  { %v3026_v61 = vpop.f32.mrb[0].mxu0  ;;  %v2102_v29 = vrot.slane %v2101_v25, 1 }
 0x17c   :  { %v2070_v62 = vadd.f32 %v3026_v61, %v4239_v52  ;;  %v1628_v63 = vpop.f32.mrb[1].mxu0 }
 0x17d   :  { %v2069_v0 = vadd.f32 %v4239_v52, %v1628_v63  ;;  %v2103_v34 = vadd.f32 %v2102_v29, %v2101_v25 }
 0x17e   :  { %v2086_v1 = vmax.f32 %v2070_v62, 0.0 }
 0x17f   :  { %v2085_v2 = vmax.f32 %v2069_v0, 0.0 }
 0x181   :  { %v2111_v3 = vadd.f32 %v2086_v1, %v2085_v2 }
 0x183   :  { %v2112_v5 = vrot.slane %v2111_v3, 4 }
 0x185   :  { %v2113_v12 = vadd.f32 %v2112_v5, %v2111_v3 }
 0x187   :  { %v2114_v22 = vrot.slane %v2113_v12, 2 }
 0x189   :  { %v2115_v27 = vadd.f32 %v2114_v22, %v2113_v12 }
 0x18b   :  { %v3005_v6 = vpop.f32.mrb[2].mxu1  ;;  %v2116_v31 = vrot.slane %v2115_v27, 1 }
 0x18c   :  { %v2068_v7 = vadd.f32 %v3005_v6, %v4239_v52  ;;  %v1547_v8 = vpop.f32.mrb[3].mxu1 }
 0x18d   :  { %v3068_v10 = vpop.f32.mrb[2].mxu0  ;;  %v2067_v11 = vadd.f32 %v4239_v52, %v1547_v8  ;;  %v2117_v37 = vadd.f32 %v2116_v31, %v2115_v27 }
 0x18e   :  { %v2084_v13 = vmax.f32 %v2068_v7, 0.0  ;;  %v2074_v14 = vadd.f32 %v3068_v10, %v4239_v52  ;;  %v1790_v15 = vpop.f32.mrb[3].mxu0 }
 0x18f   :  { %v2083_v16 = vmax.f32 %v2067_v11, 0.0  ;;  %v2073_v17 = vadd.f32 %v4239_v52, %v1790_v15 }
 0x190   :  { %v2090_v18 = vmax.f32 %v2074_v14, 0.0 }
 0x191   :  { %v2104_v20 = vadd.f32 %v2084_v13, %v2083_v16  ;;  %v2089_v21 = vmax.f32 %v2073_v17, 0.0 }
 0x193   :  { %v2105_v23 = vrot.slane %v2104_v20, 4  ;;  %v2125_v24 = vadd.f32 %v2090_v18, %v2089_v21 }
 0x195   :  { %v2106_v26 = vadd.f32 %v2105_v23, %v2104_v20  ;;  %v2126_v33 = vrot.slane %v2125_v24, 4 }
 0x197   :  { %v2107_v28 = vrot.slane %v2106_v26, 2  ;;  %v2127_v43 = vadd.f32 %v2126_v33, %v2125_v24 }
 0x199   :  { %v2108_v30 = vadd.f32 %v2107_v28, %v2106_v26  ;;  %v2128_v54 = vrot.slane %v2127_v43, 2 }
 0x19b   :  { %v2109_v32 = vrot.slane %v2108_v30, 1  ;;  %v2129_v58 = vadd.f32 %v2128_v54, %v2127_v43 }
 0x19d   :  { %v2110_v35 = vadd.f32 %v2109_v32, %v2108_v30  ;;  %v3047_v36 = vpop.f32.mrb[4].mxu1  ;;  %v2130_v61 = vrot.slane %v2129_v58, 1 }
 0x19e   :  { %v2072_v38 = vadd.f32 %v3047_v36, %v4239_v52  ;;  %v1709_v39 = vpop.f32.mrb[5].mxu1 }
 0x19f   :  { %v2185_v40 = vsel %vm2184_vm2, %v2110_v35, %v2103_v34  ;;  %v3110_v41 = vpop.f32.mrb[4].mxu0  ;;  %v2071_v42 = vadd.f32 %v4239_v52, %v1709_v39  ;;  %v2131_v2 = vadd.f32 %v2130_v61, %v2129_v58 }
 0x1a0   :  { %v2088_v44 = vmax.f32 %v2072_v38, 0.0  ;;  %v2078_v45 = vadd.f32 %v3110_v41, %v4239_v52  ;;  %v1952_v46 = vpop.f32.mrb[5].mxu0  ;;  %v2187_v47 = vsel %vm2186_vm3, %v2117_v37, %v2185_v40  ;;  %v2346_v38 = vld [vmem:[%s4267_s4] ss:$0 sm:$0xff] }
 0x1a1   :  { %v2087_v48 = vmax.f32 %v2071_v42, 0.0  ;;  %v2077_v49 = vadd.f32 %v4239_v52, %v1952_v46 }
 0x1a2   :  { %v2094_v50 = vmax.f32 %v2078_v45, 0.0 }
 0x1a3   :  { %v2118_v51 = vadd.f32 %v2088_v44, %v2087_v48  ;;  %v2093_v53 = vmax.f32 %v2077_v49, 0.0 }
 0x1a5   :  { %v2119_v55 = vrot.slane %v2118_v51, 4  ;;  %v2139_v56 = vadd.f32 %v2094_v50, %v2093_v53 }
 0x1a7   :  { %v2120_v57 = vadd.f32 %v2119_v55, %v2118_v51  ;;  %v2140_v63 = vrot.slane %v2139_v56, 4 }
 0x1a9   :  { %v2121_v59 = vrot.slane %v2120_v57, 2  ;;  %v2141_v7 = vadd.f32 %v2140_v63, %v2139_v56 }
 0x1ab   :  { %v2122_v60 = vadd.f32 %v2121_v59, %v2120_v57  ;;  %v2142_v12 = vrot.slane %v2141_v7, 2 }
 0x1ad   :  { %v2123_v62 = vrot.slane %v2122_v60, 1  ;;  %v2143_v15 = vadd.f32 %v2142_v12, %v2141_v7 }
 0x1af   :  { %v2124_v0 = vadd.f32 %v2123_v62, %v2122_v60  ;;  %v3089_v1 = vpop.f32.mrb[6].mxu1  ;;  %v2144_v18 = vrot.slane %v2143_v15, 1 }
 0x1b0   :  { %v2076_v3 = vadd.f32 %v3089_v1, %v4239_v52  ;;  %v1871_v4 = vpop.f32.mrb[7].mxu1 }
 0x1b1   :  { %v2075_v5 = vadd.f32 %v4239_v52, %v1871_v4  ;;  %v2189_v6 = vsel %vm2188_vm4, %v2124_v0, %v2187_v47  ;;  %v2145_v22 = vadd.f32 %v2144_v18, %v2143_v15 }
 0x1b2   :  { %v2092_v8 = vmax.f32 %v2076_v3, 0.0  ;;  %v2191_v9 = vsel %vm2190_vm5, %v2131_v2, %v2189_v6 }
 0x1b3   :  { %v2091_v10 = vmax.f32 %v2075_v5, 0.0 }
 0x1b5   :  { %v2132_v11 = vadd.f32 %v2092_v8, %v2091_v10 }
 0x1b7   :  { %v2133_v13 = vrot.slane %v2132_v11, 4 }
 0x1b9   :  { %v2134_v14 = vadd.f32 %v2133_v13, %v2132_v11 }
 0x1bb   :  { %v2135_v16 = vrot.slane %v2134_v14, 2 }
 0x1bd   :  { %v2136_v17 = vadd.f32 %v2135_v16, %v2134_v14 }
 0x1bf   :  { %v2137_v19 = vrot.slane %v2136_v17, 1 }
 0x1c1   :  { %v2138_v20 = vadd.f32 %v2137_v19, %v2136_v17  ;;  %v3131_v21 = vpop.f32.mrb[8].mxu1 }
 0x1c2   :  { %v2080_v23 = vadd.f32 %v3131_v21, %v4239_v52  ;;  %v2033_v24 = vpop.f32.mrb[9].mxu1 }
 0x1c3   :  { %v2079_v25 = vadd.f32 %v4239_v52, %v2033_v24  ;;  %v2193_v26 = vsel %vm2192_vm6, %v2138_v20, %v2191_v9 }
 0x1c4   :  { %v2096_v27 = vmax.f32 %v2080_v23, 0.0  ;;  %v2195_v28 = vsel %vm2194_vm7, %v2145_v22, %v2193_v26 }
 0x1c5   :  { %v2095_v29 = vmax.f32 %v2079_v25, 0.0 }
 0x1c7   :  { %v2146_v30 = vadd.f32 %v2096_v27, %v2095_v29 }
 0x1c9   :  { %v2147_v31 = vrot.slane %v2146_v30, 4 }
 0x1cb   :  { %v2148_v32 = vadd.f32 %v2147_v31, %v2146_v30 }
 0x1cd   :  { %v2149_v33 = vrot.slane %v2148_v32, 2 }
 0x1cf   :  { %v2150_v34 = vadd.f32 %v2149_v33, %v2148_v32 }
 0x1d1   :  { %v2151_v35 = vrot.slane %v2150_v34, 1 }
 0x1d3   :  { %v2152_v36 = vadd.f32 %v2151_v35, %v2150_v34 }
 0x1d5   :  { %v2197_v37 = vsel %vm2196_vm8, %v2152_v36, %v2195_v28 }
 0x1d6   :  { %3165 = vmatmul.mubr.f32.vlgmr.msra.gmra.mrb[8].mxu0 %v2197_v37 }
 0x2a9   :  { %v2265_v39 = vpop.f32.mrb[8].mxu0 }
 0x2aa   :  { %v2266_v52 = vadd.f32 %v2346_v38, %v2265_v39  ;;  %v3166_v40 = vpop.f32.mrb[9].mxu0 }
 0x2ac   :  { %v2269_v41 = vmul.f32 %v2266_v52, %v2266_v52 }
 0x2ae   :  { %2270 = vadd.xlane.f32.xlu0 %v2269_v41 }
 0x33b   :  { %v2271_v42 = vpop.xlane.xlu0 %2270 }
 0x33c   :  { %3610 = vrsqrt.f32 %v2271_v42 }
 0x346   :  { %v3611_v43 = vpop.eup %3610 }
 0x347   :  { %v2273_v44 = vmul.f32 %v3611_v43, %v2266_v52 }
 0x349   :  { %2274 = vst [vmem:[%s4268_s5] sm:$0xff] %v2273_v44 }

</bundles_post_ra>
